<compile_context>
chip_gen: v7x
topology: tpu7x:2x2x1
jax: 0.10.0
libtpu: 0.0.40
codegen_flags: <defaults>
</compile_context>

<pallas_src>
import jax
import jax.numpy as jnp
from jax.experimental import pallas as pl
from jax.experimental.pallas import tpu as pltpu


# ----------------------------------------------------------------------------
# Helpers
# ----------------------------------------------------------------------------
def _round_up(n, m):
    return ((n + m - 1) // m) * m


def _softplus(a):
    # softplus(a) = max(a, 0) + log1p(exp(-|a|))
    return jnp.maximum(a, 0.0) + jnp.log1p(jnp.exp(-jnp.abs(a)))


def _softplus_and_sigmoid(a):
    # Share one exp(-|a|) between softplus and its derivative:
    #   softplus(a) = max(a, 0) + log1p(e),      e = exp(-|a|)
    #   sigmoid(a)  = 1/(1+e)  if a >= 0 else e/(1+e)
    e = jnp.exp(-jnp.abs(a))
    sp = jnp.maximum(a, 0.0) + jnp.log1p(e)
    inv = 1.0 / (1.0 + e)
    sg = jnp.where(a >= 0.0, inv, e * inv)
    return sp, sg


# ----------------------------------------------------------------------------
# Parameter slab layout (built once at init; every matrix starts at a row
# offset that is a multiple of 8 so in-kernel views are sublane-aligned).
# ----------------------------------------------------------------------------
def _param_layout(n_inp, n_hidden, n_latent):
    I, H, L = n_inp, n_hidden, n_latent
    # (name, rows, cols).  *T entries are (in, out) layout for native forward
    # matmuls; W1/W2/W3 are torch (out, in) layout for the analytic Jacobian.
    mats = [
        ("W1T", I, H), ("W2T", H, H), ("W3T", H, L),      # encoder, (in,out)
        ("D1T", L, H), ("D2T", H, H), ("D3T", H, I),      # decoder, (in,out)
        ("W1", H, I), ("W2", H, H), ("W3", L, H),         # Jacobian, (out,in)
    ]
    lane = max(c for _, _, c in mats)
    layout = {}
    row = 0
    for name, r, c in mats:
        layout[name] = (row, r, c)
        row += _round_up(r, 8)
    # trailing 8-row bias block, one bias per row
    biases = [("b1", H), ("b2", H), ("b3", L), ("e1", H), ("e2", H), ("e3", I)]
    bias_row0 = row
    for k, (name, c) in enumerate(biases):
        layout[name] = (bias_row0 + k, 1, c)
    total_rows = bias_row0 + _round_up(len(biases), 8)
    return layout, total_rows, lane


def pack_params(params, n_inp, n_hidden, n_latent):
    """Build the single (rows, lane) f32 parameter slab ONCE at init time."""
    (W1, b1, W2, b2, W3, b3, D1, e1, D2, e2, D3, e3) = [
        jnp.asarray(p, jnp.float32) for p in params
    ]
    layout, total_rows, lane = _param_layout(n_inp, n_hidden, n_latent)
    entries = {
        "W1T": W1.T, "W2T": W2.T, "W3T": W3.T,
        "D1T": D1.T, "D2T": D2.T, "D3T": D3.T,
        "W1": W1, "W2": W2, "W3": W3,
        "b1": b1[None, :], "b2": b2[None, :], "b3": b3[None, :],
        "e1": e1[None, :], "e2": e2[None, :], "e3": e3[None, :],
    }
    slab = jnp.zeros((total_rows, lane), jnp.float32)
    for name, val in entries.items():
        r0, r, c = layout[name]
        slab = slab.at[r0:r0 + r, 0:c].set(val)
    return slab


# ----------------------------------------------------------------------------
# Fused kernel: encoder + decoder + analytic encoder-Jacobian + partial cost.
# Output per batch tile: (TB, slab_w) = [ z | x_hat | sse | jacSS | zero pad ]
# ----------------------------------------------------------------------------
def _make_kernel(n_inp, n_hidden, n_latent, layout):
    I, H, L = n_inp, n_hidden, n_latent

    def view(p_ref, name):
        r0, r, c = layout[name]
        return p_ref[r0:r0 + r, 0:c]          # free static view of VMEM slab

    def kernel(x_ref, p_ref, slab_ref):
        TB = x_ref.shape[0]
        slab_w = slab_ref.shape[1]
        x = x_ref[...]                          # (TB, I)

        # ---- encoder (keep sigmoid(a1), sigmoid(a2) in registers)
        a1 = jnp.dot(x, view(p_ref, "W1T"),
                     preferred_element_type=jnp.float32) + view(p_ref, "b1")
        h1, s1 = _softplus_and_sigmoid(a1)      # (TB, H)
        a2 = jnp.dot(h1, view(p_ref, "W2T"),
                     preferred_element_type=jnp.float32) + view(p_ref, "b2")
        h2, s2 = _softplus_and_sigmoid(a2)      # (TB, H)
        z = jnp.dot(h2, view(p_ref, "W3T"),
                    preferred_element_type=jnp.float32) + view(p_ref, "b3")

        # ---- decoder
        c1 = _softplus(jnp.dot(z, view(p_ref, "D1T"),
                               preferred_element_type=jnp.float32)
                       + view(p_ref, "e1"))
        c2 = _softplus(jnp.dot(c1, view(p_ref, "D2T"),
                               preferred_element_type=jnp.float32)
                       + view(p_ref, "e2"))
        x_hat = jnp.dot(c2, view(p_ref, "D3T"),
                        preferred_element_type=jnp.float32) + view(p_ref, "e3")

        diff = x - x_hat
        sse = jnp.sum(diff * diff, keepdims=True)            # (1, 1) partial

        # ---- analytic encoder Jacobian, batched over the whole tile:
        #   J_b = W3 @ diag(s2_b) @ W2 @ diag(s1_b) @ W1        (L, I)
        # as one (TB*L, H) @ (H, H) and one (TB*L, H) @ (H, I) contraction.
        w1 = view(p_ref, "W1")                  # (H, I)
        w2 = view(p_ref, "W2")                  # (H, H)
        w3 = view(p_ref, "W3")                  # (L, H)
        a = (s2[:, None, :] * w3[None, :, :]).reshape(TB * L, H)
        t = jnp.dot(a, w2, preferred_element_type=jnp.float32)     # (TB*L, H)
        c = (t.reshape(TB, L, H) * s1[:, None, :]).reshape(TB * L, H)
        j = jnp.dot(c, w1, preferred_element_type=jnp.float32)     # (TB*L, I)
        jac_ss = jnp.sum(j * j, keepdims=True)                      # (1, 1)

        # ---- single lane-dense output slab: one unmasked full-width store
        parts = [z, x_hat,
                 jnp.broadcast_to(sse, (TB, 1)),
                 jnp.broadcast_to(jac_ss, (TB, 1))]
        pad = slab_w - (L + I + 2)
        if pad > 0:
            parts.append(jnp.zeros((TB, pad), jnp.float32))
        slab_ref[...] = jnp.concatenate(parts, axis=-1)

    return kernel


# ----------------------------------------------------------------------------
# Wrapper factory
# ----------------------------------------------------------------------------
def make_autoencoder_forward(n_inp, n_hidden, n_latent, tile_batch=128):
    """Returns forward(param_slab, x) -> (z, cost, x_hat).

    The PyTorch module's forward returns (z, cost); x_hat is returned as well
    for validation convenience.
    """
    I, H, L = n_inp, n_hidden, n_latent
    layout, total_rows, lane = _param_layout(I, H, L)
    slab_w = pl.cdiv(L + I + 2, 128) * 128          # lane-dense output width
    kernel = _make_kernel(I, H, L, layout)

    def forward(param_slab, x):
        x = x.astype(jnp.float32)
        B = x.shape[0]
        TB = B if B <= tile_batch else tile_batch
        # TODO(synk): ragged batches (B not a multiple of TB) would need a
        # padded final tile; not required at these shapes.
        assert B % TB == 0, "batch must be a multiple of the batch tile"
        grid = (B // TB,)

        slab = pl.pallas_call(
            kernel,
            out_shape=jax.ShapeDtypeStruct((B, slab_w), jnp.float32),
            grid=grid,
            in_specs=[
                pl.BlockSpec((TB, I), lambda i: (i, 0)),
                # same block every step -> param slab DMA'd once per call
                pl.BlockSpec((total_rows, lane), lambda i: (0, 0)),
            ],
            out_specs=pl.BlockSpec((TB, slab_w), lambda i: (i, 0)),
            compiler_params=pltpu.CompilerParams(
                dimension_semantics=("parallel",)),
        )(x, param_slab)

        z = slab[:, :L]
        x_hat = slab[:, L:L + I]
        # per-tile partials (broadcast across the tile rows) -> reduce here
        sse = jnp.sum(slab[0::TB, L + I])
        jac_ss = jnp.sum(slab[0::TB, L + I + 1])
        cost = sse / (B * I) + jac_ss / (L * B * I)
        return z, cost, x_hat

    return forward


# ----------------------------------------------------------------------------
# Pure-JAX reference (uses autodiff) for a correctness sanity check.
# ----------------------------------------------------------------------------
def reference_forward(params, x):
    (W1, b1, W2, b2, W3, b3, D1, e1, D2, e2, D3, e3) = params

    def enc(x_):
        h1 = jax.nn.softplus(x_ @ W1.T + b1)
        h2 = jax.nn.softplus(h1 @ W2.T + b2)
        return h2 @ W3.T + b3

    def dec(z_):
        c1 = jax.nn.softplus(z_ @ D1.T + e1)
        c2 = jax.nn.softplus(c1 @ D2.T + e2)
        return c2 @ D3.T + e3

    z = enc(x)
    x_hat = dec(z)
    jac = jax.jacrev(lambda x_: enc(x_).sum(axis=0))(x)   # (L, B, I)
    cost = jnp.mean((x - x_hat) ** 2) + jnp.mean(jac ** 2)
    return z, cost, x_hat


def init_params(key, n_inp, n_hidden, n_latent):
    dims = [
        (n_inp, n_hidden), (n_hidden, n_hidden), (n_hidden, n_latent),   # enc
        (n_latent, n_hidden), (n_hidden, n_hidden), (n_hidden, n_inp),   # dec
    ]
    params = []
    keys = jax.random.split(key, 2 * len(dims))
    for i, (n_in, n_out) in enumerate(dims):
        bound = 1.0 / (n_in ** 0.5)
        W = jax.random.uniform(keys[2 * i], (n_out, n_in), jnp.float32,
                               -bound, bound)
        b = jax.random.uniform(keys[2 * i + 1], (n_out,), jnp.float32,
                               -bound, bound)
        params += [W, b]
    return tuple(params)


if __name__ == "__main__":
    B, n_inp, n_hidden, n_latent = 8, 16, 32, 8

    key = jax.random.PRNGKey(0)
    k_x, k_p = jax.random.split(key)
    x = jax.random.normal(k_x, (B, n_inp), dtype=jnp.float32)
    params = init_params(k_p, n_inp, n_hidden, n_latent)

    # Parameter slab built ONCE at init time (pre-transposed + packed).
    param_slab = jax.block_until_ready(
        pack_params(params, n_inp, n_hidden, n_latent))

    forward = make_autoencoder_forward(n_inp, n_hidden, n_latent)
    fwd = jax.jit(forward)
    z, cost, x_hat = fwd(param_slab, x)
    jax.block_until_ready((z, cost, x_hat))

    z_ref, cost_ref, xhat_ref = reference_forward(params, x)
    assert jnp.allclose(z, z_ref, atol=1e-4, rtol=1e-4)
    assert jnp.allclose(x_hat, xhat_ref, atol=1e-4, rtol=1e-4)
    assert jnp.allclose(cost, cost_ref, atol=1e-4, rtol=1e-4)

    print("KERNEL_OK")
</pallas_src>

<mosaic_0001>
module attributes {stable_mosaic.version = 11 : i64} {
  func.func @kernel(%arg0: i32, %arg1: memref<8x16xf32, #tpu.memory_space<vmem>>, %arg2: memref<232x32xf32, #tpu.memory_space<vmem>>, %arg3: memref<8x128xf32, #tpu.memory_space<vmem>>) attributes {dimension_semantics = [#tpu.dimension_semantics<parallel>], iteration_bounds = array<i64: 1>, scalar_prefetch = 0 : i64, scratch_operands = 0 : i64, tpu.core_type = #tpu.core_type<tc>, window_params = [{transform_indices = @transform_0, window_bounds = array<i64: 8, 16>}, {pipeline_mode = #tpu.pipeline_mode<synchronous>, transform_indices = @transform_1, window_bounds = array<i64: 232, 32>}, {transform_indices = @transform_2, window_bounds = array<i64: 8, 128>}]} {
    %c0 = arith.constant 0 : index
    %c0_0 = arith.constant 0 : index
    %0 = vector.load %arg1[%c0, %c0_0] : memref<8x16xf32, #tpu.memory_space<vmem>>, vector<8x16xf32>
    %c0_1 = arith.constant 0 : index
    %c0_2 = arith.constant 0 : index
    %1 = vector.load %arg2[%c0_1, %c0_2] : memref<232x32xf32, #tpu.memory_space<vmem>>, vector<16x32xf32>
    %cst = arith.constant dense<0.000000e+00> : vector<8x32xf32>
    %2 = tpu.matmul %0, %1, %cst {dimension_numbers = #tpu.dot_dimension_numbers<[1], [0], [0], [1], [0, 0, 1, 1], [], []>} : vector<8x16xf32>, vector<16x32xf32>, vector<8x32xf32> -> vector<8x32xf32>
    %c224 = arith.constant 224 : index
    %c0_3 = arith.constant 0 : index
    %3 = vector.load %arg2[%c224, %c0_3] : memref<232x32xf32, #tpu.memory_space<vmem>>, vector<1x32xf32>
    %4 = vector.broadcast %3 : vector<1x32xf32> to vector<8x32xf32>
    %5 = arith.addf %2, %4 : vector<8x32xf32>
    %6 = math.absf %5 : vector<8x32xf32>
    %cst_4 = arith.constant 0.000000e+00 : f32
    %7 = vector.broadcast %cst_4 : f32 to vector<8x32xf32>
    %8 = arith.subf %7, %6 : vector<8x32xf32>
    %9 = math.exp %8 : vector<8x32xf32>
    %cst_5 = arith.constant 0.000000e+00 : f32
    %10 = vector.broadcast %cst_5 : f32 to vector<8x32xf32>
    %11 = arith.maximumf %5, %10 : vector<8x32xf32>
    %12 = math.log1p %9 : vector<8x32xf32>
    %13 = arith.addf %11, %12 : vector<8x32xf32>
    %cst_6 = arith.constant 1.000000e+00 : f32
    %14 = vector.broadcast %cst_6 : f32 to vector<8x32xf32>
    %15 = arith.addf %14, %9 : vector<8x32xf32>
    %cst_7 = arith.constant 1.000000e+00 : f32
    %16 = vector.broadcast %cst_7 : f32 to vector<8x32xf32>
    %17 = arith.divf %16, %15 : vector<8x32xf32>
    %cst_8 = arith.constant 0.000000e+00 : f32
    %18 = vector.broadcast %cst_8 : f32 to vector<8x32xf32>
    %19 = arith.cmpf oge, %5, %18 : vector<8x32xf32>
    %20 = arith.mulf %9, %17 : vector<8x32xf32>
    %21 = arith.select %19, %17, %20 : vector<8x32xi1>, vector<8x32xf32>
    %c16 = arith.constant 16 : index
    %c0_9 = arith.constant 0 : index
    %22 = vector.load %arg2[%c16, %c0_9] : memref<232x32xf32, #tpu.memory_space<vmem>>, vector<32x32xf32>
    %cst_10 = arith.constant dense<0.000000e+00> : vector<8x32xf32>
    %23 = tpu.matmul %13, %22, %cst_10 {dimension_numbers = #tpu.dot_dimension_numbers<[1], [0], [0], [1], [0, 0, 1, 1], [], []>} : vector<8x32xf32>, vector<32x32xf32>, vector<8x32xf32> -> vector<8x32xf32>
    %c225 = arith.constant 225 : index
    %c0_11 = arith.constant 0 : index
    %24 = vector.load %arg2[%c225, %c0_11] : memref<232x32xf32, #tpu.memory_space<vmem>>, vector<1x32xf32>
    %25 = vector.broadcast %24 : vector<1x32xf32> to vector<8x32xf32>
    %26 = arith.addf %23, %25 : vector<8x32xf32>
    %27 = math.absf %26 : vector<8x32xf32>
    %cst_12 = arith.constant 0.000000e+00 : f32
    %28 = vector.broadcast %cst_12 : f32 to vector<8x32xf32>
    %29 = arith.subf %28, %27 : vector<8x32xf32>
    %30 = math.exp %29 : vector<8x32xf32>
    %cst_13 = arith.constant 0.000000e+00 : f32
    %31 = vector.broadcast %cst_13 : f32 to vector<8x32xf32>
    %32 = arith.maximumf %26, %31 : vector<8x32xf32>
    %33 = math.log1p %30 : vector<8x32xf32>
    %34 = arith.addf %32, %33 : vector<8x32xf32>
    %cst_14 = arith.constant 1.000000e+00 : f32
    %35 = vector.broadcast %cst_14 : f32 to vector<8x32xf32>
    %36 = arith.addf %35, %30 : vector<8x32xf32>
    %cst_15 = arith.constant 1.000000e+00 : f32
    %37 = vector.broadcast %cst_15 : f32 to vector<8x32xf32>
    %38 = arith.divf %37, %36 : vector<8x32xf32>
    %cst_16 = arith.constant 0.000000e+00 : f32
    %39 = vector.broadcast %cst_16 : f32 to vector<8x32xf32>
    %40 = arith.cmpf oge, %26, %39 : vector<8x32xf32>
    %41 = arith.mulf %30, %38 : vector<8x32xf32>
    %42 = arith.select %40, %38, %41 : vector<8x32xi1>, vector<8x32xf32>
    %c48 = arith.constant 48 : index
    %c0_17 = arith.constant 0 : index
    %43 = vector.load %arg2[%c48, %c0_17] : memref<232x32xf32, #tpu.memory_space<vmem>>, vector<32x8xf32>
    %cst_18 = arith.constant dense<0.000000e+00> : vector<8x8xf32>
    %44 = tpu.matmul %34, %43, %cst_18 {dimension_numbers = #tpu.dot_dimension_numbers<[1], [0], [0], [1], [0, 0, 1, 1], [], []>} : vector<8x32xf32>, vector<32x8xf32>, vector<8x8xf32> -> vector<8x8xf32>
    %c226 = arith.constant 226 : index
    %c0_19 = arith.constant 0 : index
    %45 = vector.load %arg2[%c226, %c0_19] : memref<232x32xf32, #tpu.memory_space<vmem>>, vector<1x8xf32>
    %46 = vector.broadcast %45 : vector<1x8xf32> to vector<8x8xf32>
    %47 = arith.addf %44, %46 : vector<8x8xf32>
    %c80 = arith.constant 80 : index
    %c0_20 = arith.constant 0 : index
    %48 = vector.load %arg2[%c80, %c0_20] : memref<232x32xf32, #tpu.memory_space<vmem>>, vector<8x32xf32>
    %cst_21 = arith.constant dense<0.000000e+00> : vector<8x32xf32>
    %49 = tpu.matmul %47, %48, %cst_21 {dimension_numbers = #tpu.dot_dimension_numbers<[1], [0], [0], [1], [0, 0, 1, 1], [], []>} : vector<8x8xf32>, vector<8x32xf32>, vector<8x32xf32> -> vector<8x32xf32>
    %c227 = arith.constant 227 : index
    %c0_22 = arith.constant 0 : index
    %50 = vector.load %arg2[%c227, %c0_22] : memref<232x32xf32, #tpu.memory_space<vmem>>, vector<1x32xf32>
    %51 = vector.broadcast %50 : vector<1x32xf32> to vector<8x32xf32>
    %52 = arith.addf %49, %51 : vector<8x32xf32>
    %cst_23 = arith.constant 0.000000e+00 : f32
    %53 = vector.broadcast %cst_23 : f32 to vector<8x32xf32>
    %54 = arith.maximumf %52, %53 : vector<8x32xf32>
    %55 = math.absf %52 : vector<8x32xf32>
    %cst_24 = arith.constant 0.000000e+00 : f32
    %56 = vector.broadcast %cst_24 : f32 to vector<8x32xf32>
    %57 = arith.subf %56, %55 : vector<8x32xf32>
    %58 = math.exp %57 : vector<8x32xf32>
    %59 = math.log1p %58 : vector<8x32xf32>
    %60 = arith.addf %54, %59 : vector<8x32xf32>
    %c88 = arith.constant 88 : index
    %c0_25 = arith.constant 0 : index
    %61 = vector.load %arg2[%c88, %c0_25] : memref<232x32xf32, #tpu.memory_space<vmem>>, vector<32x32xf32>
    %cst_26 = arith.constant dense<0.000000e+00> : vector<8x32xf32>
    %62 = tpu.matmul %60, %61, %cst_26 {dimension_numbers = #tpu.dot_dimension_numbers<[1], [0], [0], [1], [0, 0, 1, 1], [], []>} : vector<8x32xf32>, vector<32x32xf32>, vector<8x32xf32> -> vector<8x32xf32>
    %c228 = arith.constant 228 : index
    %c0_27 = arith.constant 0 : index
    %63 = vector.load %arg2[%c228, %c0_27] : memref<232x32xf32, #tpu.memory_space<vmem>>, vector<1x32xf32>
    %64 = vector.broadcast %63 : vector<1x32xf32> to vector<8x32xf32>
    %65 = arith.addf %62, %64 : vector<8x32xf32>
    %cst_28 = arith.constant 0.000000e+00 : f32
    %66 = vector.broadcast %cst_28 : f32 to vector<8x32xf32>
    %67 = arith.maximumf %65, %66 : vector<8x32xf32>
    %68 = math.absf %65 : vector<8x32xf32>
    %cst_29 = arith.constant 0.000000e+00 : f32
    %69 = vector.broadcast %cst_29 : f32 to vector<8x32xf32>
    %70 = arith.subf %69, %68 : vector<8x32xf32>
    %71 = math.exp %70 : vector<8x32xf32>
    %72 = math.log1p %71 : vector<8x32xf32>
    %73 = arith.addf %67, %72 : vector<8x32xf32>
    %c120 = arith.constant 120 : index
    %c0_30 = arith.constant 0 : index
    %74 = vector.load %arg2[%c120, %c0_30] : memref<232x32xf32, #tpu.memory_space<vmem>>, vector<32x16xf32>
    %cst_31 = arith.constant dense<0.000000e+00> : vector<8x16xf32>
    %75 = tpu.matmul %73, %74, %cst_31 {dimension_numbers = #tpu.dot_dimension_numbers<[1], [0], [0], [1], [0, 0, 1, 1], [], []>} : vector<8x32xf32>, vector<32x16xf32>, vector<8x16xf32> -> vector<8x16xf32>
    %c229 = arith.constant 229 : index
    %c0_32 = arith.constant 0 : index
    %76 = vector.load %arg2[%c229, %c0_32] : memref<232x32xf32, #tpu.memory_space<vmem>>, vector<1x16xf32>
    %77 = vector.broadcast %76 : vector<1x16xf32> to vector<8x16xf32>
    %78 = arith.addf %75, %77 : vector<8x16xf32>
    %79 = arith.subf %0, %78 : vector<8x16xf32>
    %80 = arith.mulf %79, %79 : vector<8x16xf32>
    %81 = vector.shape_cast %80 : vector<8x16xf32> to vector<1x8x16xf32>
    %cst_33 = arith.constant dense<0.000000e+00> : vector<1xf32>
    %82 = vector.multi_reduction <add>, %81, %cst_33 [1, 2] : vector<1x8x16xf32> to vector<1xf32>
    %83 = vector.shape_cast %82 : vector<1xf32> to vector<1x1x1xf32>
    %84 = vector.extract %83[0, 0, 0] : f32 from vector<1x1x1xf32>
    %85 = vector.broadcast %84 : f32 to vector<1x1xf32>
    %c152 = arith.constant 152 : index
    %c0_34 = arith.constant 0 : index
    %86 = vector.load %arg2[%c152, %c0_34] : memref<232x32xf32, #tpu.memory_space<vmem>>, vector<32x16xf32>
    %c184 = arith.constant 184 : index
    %c0_35 = arith.constant 0 : index
    %87 = vector.load %arg2[%c184, %c0_35] : memref<232x32xf32, #tpu.memory_space<vmem>>, vector<32x32xf32>
    %c216 = arith.constant 216 : index
    %c0_36 = arith.constant 0 : index
    %88 = vector.load %arg2[%c216, %c0_36] : memref<232x32xf32, #tpu.memory_space<vmem>>, vector<8x32xf32>
    %89 = vector.shape_cast %42 : vector<8x32xf32> to vector<8x1x32xf32>
    %90 = vector.shape_cast %88 : vector<8x32xf32> to vector<1x8x32xf32>
    %91 = vector.broadcast %89 : vector<8x1x32xf32> to vector<8x8x32xf32>
    %92 = vector.broadcast %90 : vector<1x8x32xf32> to vector<8x8x32xf32>
    %93 = arith.mulf %91, %92 : vector<8x8x32xf32>
    %94 = vector.shape_cast %93 : vector<8x8x32xf32> to vector<64x32xf32>
    %cst_37 = arith.constant dense<0.000000e+00> : vector<64x32xf32>
    %95 = tpu.matmul %94, %87, %cst_37 {dimension_numbers = #tpu.dot_dimension_numbers<[1], [0], [0], [1], [0, 0, 1, 1], [], []>} : vector<64x32xf32>, vector<32x32xf32>, vector<64x32xf32> -> vector<64x32xf32>
    %96 = vector.shape_cast %95 : vector<64x32xf32> to vector<8x8x32xf32>
    %97 = vector.shape_cast %21 : vector<8x32xf32> to vector<8x1x32xf32>
    %98 = vector.broadcast %97 : vector<8x1x32xf32> to vector<8x8x32xf32>
    %99 = arith.mulf %96, %98 : vector<8x8x32xf32>
    %100 = vector.shape_cast %99 : vector<8x8x32xf32> to vector<64x32xf32>
    %cst_38 = arith.constant dense<0.000000e+00> : vector<64x16xf32>
    %101 = tpu.matmul %100, %86, %cst_38 {dimension_numbers = #tpu.dot_dimension_numbers<[1], [0], [0], [1], [0, 0, 1, 1], [], []>} : vector<64x32xf32>, vector<32x16xf32>, vector<64x16xf32> -> vector<64x16xf32>
    %102 = arith.mulf %101, %101 : vector<64x16xf32>
    %103 = vector.shape_cast %102 : vector<64x16xf32> to vector<1x64x16xf32>
    %cst_39 = arith.constant dense<0.000000e+00> : vector<1xf32>
    %104 = vector.multi_reduction <add>, %103, %cst_39 [1, 2] : vector<1x64x16xf32> to vector<1xf32>
    %105 = vector.shape_cast %104 : vector<1xf32> to vector<1x1x1xf32>
    %106 = vector.extract %105[0, 0, 0] : f32 from vector<1x1x1xf32>
    %107 = vector.broadcast %106 : f32 to vector<1x1xf32>
    %108 = vector.shape_cast %85 : vector<1x1xf32> to vector<1x1xf32>
    %109 = vector.broadcast %108 : vector<1x1xf32> to vector<8x1xf32>
    %110 = vector.shape_cast %107 : vector<1x1xf32> to vector<1x1xf32>
    %111 = vector.broadcast %110 : vector<1x1xf32> to vector<8x1xf32>
    %cst_40 = arith.constant 0.000000e+00 : f32
    %112 = vector.broadcast %cst_40 : f32 to vector<8x102xf32>
    %113 = tpu.concatenate %47, %78, %109, %111, %112 in 1 : vector<8x8xf32>, vector<8x16xf32>, vector<8x1xf32>, vector<8x1xf32>, vector<8x102xf32> -> vector<8x128xf32>
    %c0_41 = arith.constant 0 : index
    %c0_42 = arith.constant 0 : index
    %114 = vector.load %arg3[%c0_41, %c0_42] : memref<8x128xf32, #tpu.memory_space<vmem>>, vector<8x128xf32>
    tpu.vector_store %arg3[%c0_41, %c0_42], %113 {strides = array<i32>} : memref<8x128xf32, #tpu.memory_space<vmem>>, vector<8x128xf32>,
    return
  }
  func.func @transform_0(%arg0: i32) -> (i32, i32) {
    %c0_i32 = arith.constant 0 : i32
    %c0_i32_0 = arith.constant 0 : i32
    return %arg0, %c0_i32 : i32, i32
  }
  func.func @transform_1(%arg0: i32) -> (i32, i32) {
    %c0_i32 = arith.constant 0 : i32
    %c0_i32_0 = arith.constant 0 : i32
    %c0_i32_1 = arith.constant 0 : i32
    return %c0_i32, %c0_i32_0 : i32, i32
  }
  func.func @transform_2(%arg0: i32) -> (i32, i32) {
    %c0_i32 = arith.constant 0 : i32
    %c0_i32_0 = arith.constant 0 : i32
    return %arg0, %c0_i32 : i32, i32
  }
}

</mosaic_0001>

<bundles_post_ra>
// kernel: forward.1
= control target key start
LH: loop header
LB: loop body
LE: loop exit
PB: predicated region body
PF: predicated region fallthrough
CT: control target
= control target key end

     0   :  { %v1344_v0 = vmov 0.0|0.0   ;;  %vm1345_vm0 = vmmov 0   ;;  %v1346_v3 = vmov 0.0   ;;  %vm19_vm1 = vcmask 130048   ;;  %s1348_s20 = smov 8   ;;  %s1575_s1 = inlined_call_operand.vmem [shape: f32[232,32], index: 1, kind: input, shape index: {}]   ;;  %s1576_s0 = inlined_call_operand.vmem [shape: f32[8,16], index: 0, kind: input, shape index: {}]   ;;  %s1577_s2 = inlined_call_operand.vmem [shape: f32[8,128], index: 2, kind: output, shape index: {}]  }
   0x1   :  { %1272 = vmatprep.subr.bf16.mxu0 %v1344_v0  ;;  %v12_v1 = vld [vmem:[%s1575_s1] sm:$0xff]  ;;  %v13_v2 = vld [vmem:[%s1575_s1 + $0x8] sm:$0xff]  ;;  %1180 = vmatprep.mubr.msk.f32.mxu0 %vm1345_vm0, %v1346_v3  ;;  %v114_v6 = vld [vmem:[%s1575_s1 + $0x10] sm:$0xff]  ;;  %vm123_vm4 = vcmask 261120   ;;  %vm306_vm7 = vcmask 64512   ;;  %vm1088_vm10 = vcmask 195584  }
   0x2   :  { %v1273_v4 = vpack.c.bf16 %v13_v2, %v12_v1  ;;  %1275 = vmatprep.subr.bf16.mxu1 %v1344_v0  ;;  %1191 = vmatprep.mubr.msk.f32.mxu1 %vm1345_vm0, %v1346_v3  ;;  %v1379_v5 = vld [vmem:[%s1576_s0] sm:$0xff]  ;;  %v115_v7 = vld [vmem:[%s1575_s1 + $0x18] sm:$0xff]  ;;  %v117_v10 = vld [vmem:[%s1575_s1 + $0x28] sm:$0xff]  ;;  %vm1090_vm11 = vcmask 203776   ;;  %vm1092_vm12 = vcmask 211968  }
   0x3   :  { %v1276_v8 = vpack.c.bf16 %v115_v7, %v114_v6  ;;  %v116_v9 = vld [vmem:[%s1575_s1 + $0x20] sm:$0xff]  ;;  %v218_v33 = vld [vmem:[%s1575_s1 + $0x30] sm:$0xff]  ;;  %v219_v34 = vld [vmem:[%s1575_s1 + $0x38] sm:$0xff] }
   0x4   :  { %1274 = vmatpush3.bf16.msra.mxu0 %v1273_v4  ;;  %v1279_v11 = vpack.c.bf16 %v117_v10, %v116_v9  ;;  %v1099_v12 = vld [vmem:[%s1575_s1 + $0xe0] ss:$0 sm:$0xff]  ;;  %v1282_v35 = vpack.c.bf16 %v219_v34, %v218_v33  ;;  %v221_v37 = vld [vmem:[%s1575_s1 + $0x48] sm:$0xff]  ;;  %v300_v39 = vld [vmem:[%s1575_s1 + $0x50] sm:$0xff] }
   0x5   :  { %1281 = vmatprep.subr.bf16.mxu0 %v1344_v0  ;;  %1277 = vmatpush3.bf16.msra.mxu1 %v1276_v8  ;;  %v220_v36 = vld [vmem:[%s1575_s1 + $0x40] sm:$0xff]  ;;  %v395_v2 = vld [vmem:[%s1575_s1 + $0x58] sm:$0xff]  ;;  %v397_v7 = vld [vmem:[%s1575_s1 + $0x68] sm:$0xff] }
   0x6   :  { %1278 = vmatprep.subr.bf16.mxu1 %v1344_v0  ;;  %v1285_v38 = vpack.c.bf16 %v221_v37, %v220_v36  ;;  %v1101_v40 = vld [vmem:[%s1575_s1 + $0xe1] ss:$0 sm:$0xff]  ;;  %v1103_v61 = vld [vmem:[%s1575_s1 + $0xe2] ss:$0 sm:$0xff]  ;;  %v590_v9 = vld [vmem:[%s1575_s1 + $0xb8] sm:$0xff] }
   0x7   :  { %1181 = vmatmul.mubr.msk.f32.vlgmr.msra.gmra.mrb[0].mxu0 %vm19_vm1, %v1379_v5  ;;  %v396_v4 = vld [vmem:[%s1575_s1 + $0x60] sm:$0xff] }
   0x8   :  { %1202 = vmatprep.mubr.msk.f32.mxu0 %vm1345_vm0, %v1346_v3  ;;  %1283 = vmatpush3.bf16.msra.mxu0 %v1282_v35  ;;  %v1288_v6 = vpack.c.bf16 %v396_v4, %v395_v2  ;;  %v591_v10 = vld [vmem:[%s1575_s1 + $0xc0] sm:$0xff] }
   0x9   :  { %1280 = vmatpush3.bf16.msra.mxu1 %v1279_v11  ;;  %1284 = vmatprep.subr.bf16.mxu0 %v1344_v0  ;;  %v1299_v11 = vpack.c.bf16 %v591_v10, %v590_v9  ;;  %v492_v10 = vld [vmem:[%s1575_s1 + $0x78] sm:$0xff] }
   0xa   :  { %1205 = vmatprep.subr.mxu1 %v1346_v3 }
   0xc   :  { %1286 = vmatpush3.bf16.msra.mxu0 %v1285_v38 }
   0xd   :  { %1287 = vmatprep.subr.bf16.mxu0 %v1344_v0 }
  0xda   :  { %v89_v13 = vpop.f32.mrb[0].mxu0 }
  0xdb   :  { %v90_v14 = vadd.f32 %v1099_v12, %v89_v13  ;;  %v1182_v15 = vpop.f32.mrb[1].mxu0  ;;  %v1105_v12 = vld [vmem:[%s1575_s1 + $0xe3] ss:$0 sm:$0xff] }
  0xdd   :  { %v93_v16 = vand.u32 2147483647, %v90_v14  ;;  %v97_v28 = vmax.f32 %v90_v14, 0.0  ;;  %vm111_vm3 = vcmp.ge.f32.partialorder %v90_v14, 0.0 }
  0xdf   :  { %v94_v17 = vsub.f32 0.0, %v93_v16 }
  0xe1   :  { %v95_v18 = vmul.f32 1.442695, %v94_v17 }
  0xe3   :  { %1324 = vpow2.f32 %v95_v18 }
  0xed   :  { %v1325_v19 = vpop.eup %1324 }
  0xee   :  { %v98_v20 = vadd.f32 1.0, %v1325_v19  ;;  %v101_v21 = vmul.f32 -0.5, %v1325_v19  ;;  %v104_v23 = vand.u32 2147483647, %v1325_v19 }
  0xf0   :  { %1326 = vlog2.f32 %v98_v20  ;;  %v102_v22 = vadd.f32 1.0, %v101_v21  ;;  %vm105_vm2 = vcmp.lt.f32.partialorder %v104_v23, 0.0004427343  ;;  %v600_v21 = vlaneseq }
  0xf1   :  { %1328 = vrcp.f32 %v98_v20 }
  0xf2   :  { %v103_v27 = vmul.f32 %v1325_v19, %v102_v22 }
  0xfa   :  { %v1327_v24 = vpop.eup %1326 }
  0xfb   :  { %v1329_v25 = vpop.eup %1328  ;;  %v100_v26 = vmul.f32 0.6931472, %v1327_v24  ;;  %v601_v24 = vshrl.u32 %v600_v21, 7 }
  0xfc   :  { %v112_v29 = vmul.f32 %v1329_v25, %v1325_v19  ;;  %v1347_v19 = vmov 1966171168  }
  0xfd   :  { %v106_v30 = vsel %vm105_vm2, %v103_v27, %v100_v26  ;;  %v598_v20 = vunpack.c.l.s4 %v1347_v19  ;;  %v1467_v33 = vsub.s32 0, %v601_v24  ;;  %v1107_v19 = vld [vmem:[%s1575_s1 + $0xe4] ss:$0 sm:$0xff] }
  0xfe   :  { %v107_v31 = vadd.f32 %v106_v30, %v97_v28  ;;  %v1403_v32 = vsel %vm111_vm3, %v1329_v25, %v112_v29 }
  0xff   :  { %v599_v23 = vunpack.c.0.s8 %v598_v20  ;;  %v823_v20 = vcombine.high %v1403_v32, %v1403_v32 }
 0x100   :  { %1192 = vmatmul.mubr.msk.f32.vlgmr.msra.gmra.mrb[0].mxu1 %vm123_vm4, %v107_v31 }
 0x101   :  { %1207 = vmatprep.mubr.msk.f32.mxu1 %vm1345_vm0, %v1346_v3  ;;  %1206 = vmatpush3.msra.mxu1 %v300_v39  ;;  %v1463_v26 = vsub.s32 %v599_v23, %v601_v24 }
 0x102   :  { %1293 = vmatprep.subr.bf16.mxu1 %v1344_v0 }
 0x1d3   :  { %v193_v41 = vpop.f32.mrb[0].mxu1 }
 0x1d4   :  { %v194_v42 = vadd.f32 %v1101_v40, %v193_v41  ;;  %v1193_v43 = vpop.f32.mrb[1].mxu1  ;;  %v592_v40 = vld [vmem:[%s1575_s1 + $0xc8] sm:$0xff]  ;;  %v593_v41 = vld [vmem:[%s1575_s1 + $0xd0] sm:$0xff] }
 0x1d5   :  { %v594_v43 = vld [vmem:[%s1575_s1 + $0xd8] sm:$0xff] }
 0x1d6   :  { %v197_v44 = vand.u32 2147483647, %v194_v42  ;;  %v201_v56 = vmax.f32 %v194_v42, 0.0  ;;  %vm215_vm6 = vcmp.ge.f32.partialorder %v194_v42, 0.0 }
 0x1d8   :  { %v198_v45 = vsub.f32 0.0, %v197_v44 }
 0x1da   :  { %v199_v46 = vmul.f32 1.442695, %v198_v45 }
 0x1dc   :  { %1330 = vpow2.f32 %v199_v46 }
 0x1e6   :  { %v1331_v47 = vpop.eup %1330 }
 0x1e7   :  { %v202_v48 = vadd.f32 1.0, %v1331_v47  ;;  %v205_v49 = vmul.f32 -0.5, %v1331_v47  ;;  %v208_v51 = vand.u32 2147483647, %v1331_v47 }
 0x1e9   :  { %1332 = vlog2.f32 %v202_v48  ;;  %v206_v50 = vadd.f32 1.0, %v205_v49  ;;  %vm209_vm5 = vcmp.lt.f32.partialorder %v208_v51, 0.0004427343 }
 0x1ea   :  { %1334 = vrcp.f32 %v202_v48  ;;  %v1303_v48 = vpack.c.bf16 %v593_v41, %v592_v40 }
 0x1eb   :  { %v207_v55 = vmul.f32 %v1331_v47, %v206_v50 }
 0x1f3   :  { %v1333_v52 = vpop.eup %1332 }
 0x1f4   :  { %v1335_v53 = vpop.eup %1334  ;;  %v204_v54 = vmul.f32 0.6931472, %v1333_v52 }
 0x1f5   :  { %v216_v57 = vmul.f32 %v1335_v53, %v1331_v47 }
 0x1f6   :  { %v210_v58 = vsel %vm209_vm5, %v207_v55, %v204_v54 }
 0x1f7   :  { %v211_v59 = vadd.f32 %v210_v58, %v201_v56  ;;  %v217_v60 = vsel %vm215_vm6, %v1335_v53, %v216_v57 }
 0x1f8   :  { %v603_v27 = vrot.slane %v217_v60, %v1463_v26  ;;  %v596_v35 = vcombine.high %v217_v60, %v217_v60 }
 0x1f9   :  { %1203 = vmatmul.mubr.msk.f32.vlgmr.msra.gmra.mrb[2].mxu0 %vm123_vm4, %v211_v59 }
 0x1fa   :  { %1218 = vmatprep.mubr.msk.f32.mxu0 %vm1345_vm0, %v1346_v3  ;;  %1289 = vmatpush3.bf16.msra.mxu0 %v1288_v6  ;;  %v619_v29 = vrot.slane %v603_v27, %v1463_v26  ;;  %v611_v36 = vcombine.high %v603_v27, %v603_v27  ;;  %v610_v45 = vrot.slane %v596_v35, %v1463_v26 }
 0x1fb   :  { %1290 = vmatprep.subr.bf16.mxu0 %v1344_v0 }
 0x1fc   :  { %v648_v39 = vrot.slane %v619_v29, %v1467_v33  ;;  %v633_v46 = vrot.slane %v611_v36, %v1463_v26  ;;  %v641_v50 = vcombine.high %v619_v29, %v619_v29  ;;  %v612_v51 = vcombine.high %v610_v45, %v610_v45 }
 0x1fd   :  { %v626_v55 = vrot.slane %v610_v45, %v1463_v26 }
 0x1fe   :  { %v685_v49 = vmul.f32 %v648_v39, %v594_v43  ;;  %v652_v52 = vrot.slane %v633_v46, %v1467_v33  ;;  %v643_v53 = vcombine.high %v633_v46, %v633_v46  ;;  %v656_v54 = vrot.slane %v641_v50, %v1467_v33 }
 0x1ff   :  { %v640_v58 = vrot.slane %v612_v51, %v1463_v26  ;;  %v664_v60 = vrot.slane %v626_v55, %v1467_v33 }
 0x200   :  { %v686_v56 = vmul.f32 %v652_v52, %v594_v43  ;;  %v660_v57 = vrot.slane %v643_v53, %v1467_v33  ;;  %v687_v59 = vmul.f32 %v656_v54, %v594_v43 }
 0x201   :  { %v644_v2 = vcombine.high %v640_v58, %v640_v58  ;;  %v689_v4 = vmul.f32 %v664_v60, %v594_v43 }
 0x2cc   :  { %v296_v62 = vpop.f32.mrb[2].mxu0 }
 0x2cd   :  { %v1435_v63 = vadd.f32 %v1103_v61, %v296_v62  ;;  %v1204_v1 = vpop.f32.mrb[3].mxu0  ;;  %v642_v61 = vcombine.high %v626_v55, %v626_v55  ;;  %v688_v62 = vmul.f32 %v660_v57, %v594_v43 }
 0x2ce   :  { %v668_v1 = vrot.slane %v640_v58, %v1467_v33 }
 0x2cf   :  { %1208 = vmatmul.mubr.msk.f32.vlgmr.msra.gmra.mrb[2].mxu1 %vm306_vm7, %v1435_v63  ;;  %v672_v6 = vrot.slane %v642_v61, %v1467_v33 }
 0x2d0   :  { %1229 = vmatprep.mubr.msk.f32.mxu1 %vm1345_vm0, %v1346_v3  ;;  %v398_v3 = vld [vmem:[%s1575_s1 + $0x70] sm:$0xff] }
 0x2d1   :  { %v1291_v8 = vpack.c.bf16 %v398_v3, %v397_v7  ;;  %v690_v7 = vmul.f32 %v668_v1, %v594_v43  ;;  %v676_v3 = vrot.slane %v644_v2, %v1467_v33 }
 0x2d3   :  { %1292 = vmatpush3.bf16.msra.mxu0 %v1291_v8  ;;  %v691_v8 = vmul.f32 %v672_v6, %v594_v43  ;;  %v692_v9 = vmul.f32 %v676_v3, %v594_v43 }
 0x2d4   :  { %1300 = vmatprep.subr.bf16.mxu0 %v1299_v11 }
 0x3a2   :  { %v376_v13 = vpop.f32.mrb[2].mxu1 }
 0x3a3   :  { %v377_v14 = vadd.f32 %v1105_v12, %v376_v13  ;;  %v1209_v15 = vpop.f32.mrb[3].mxu1  ;;  %v494_v13 = vld [vmem:[%s1575_s1 + $0x88] sm:$0xff] }
 0x3a5   :  { %v381_v16 = vand.u32 2147483647, %v377_v14  ;;  %v380_v42 = vmax.f32 %v377_v14, 0.0  ;;  %v495_v14 = vld [vmem:[%s1575_s1 + $0x90] sm:$0xff] }
 0x3a6   :  { %v1297_v15 = vpack.c.bf16 %v495_v14, %v494_v13 }
 0x3a7   :  { %v382_v17 = vsub.f32 0.0, %v381_v16  ;;  %v586_v16 = vld [vmem:[%s1575_s1 + $0x98] sm:$0xff] }
 0x3a9   :  { %v383_v18 = vmul.f32 1.442695, %v382_v17  ;;  %v587_v17 = vld [vmem:[%s1575_s1 + $0xa0] sm:$0xff] }
 0x3ab   :  { %1336 = vpow2.f32 %v383_v18  ;;  %v1518_v18 = vpack.c.bf16 %v587_v17, %v586_v16 }
 0x3b5   :  { %v1337_v22 = vpop.eup %1336 }
 0x3b6   :  { %v385_v25 = vadd.f32 1.0, %v1337_v22  ;;  %v388_v28 = vmul.f32 -0.5, %v1337_v22  ;;  %v391_v31 = vand.u32 2147483647, %v1337_v22 }
 0x3b8   :  { %1338 = vlog2.f32 %v385_v25  ;;  %v389_v30 = vadd.f32 1.0, %v388_v28  ;;  %vm392_vm8 = vcmp.lt.f32.partialorder %v391_v31, 0.0004427343  ;;  %v837_v28 = vrot.slane %v823_v20, %v1463_v26 }
 0x3ba   :  { %v390_v38 = vmul.f32 %v1337_v22, %v389_v30  ;;  %v839_v36 = vcombine.high %v837_v28, %v837_v28  ;;  %v853_v46 = vrot.slane %v837_v28, %v1463_v26 }
 0x3bc   :  { %v867_v43 = vrot.slane %v839_v36, %v1463_v26  ;;  %v891_v53 = vrot.slane %v853_v46, %v1467_v33  ;;  %v869_v54 = vcombine.high %v853_v46, %v853_v46 }
 0x3be   :  { %v895_v50 = vrot.slane %v867_v43, %v1467_v33  ;;  %v871_v51 = vcombine.high %v867_v43, %v867_v43 }
 0x3c2   :  { %v1339_v34 = vpop.eup %1338 }
 0x3c3   :  { %v387_v37 = vmul.f32 0.6931472, %v1339_v34 }
 0x3c5   :  { %v393_v44 = vsel %vm392_vm8, %v390_v38, %v387_v37 }
 0x3c6   :  { %v394_v47 = vadd.f32 %v393_v44, %v380_v42 }
 0x3c8   :  { %1219 = vmatmul.mubr.msk.f32.vlgmr.msra.gmra.mrb[4].mxu0 %vm123_vm4, %v394_v47 }
 0x3c9   :  { %1302 = vmatpush3.bf16.msra.mxu0 %v1299_v11  ;;  %1240 = vmatprep.mubr.msk.f32.mxu0 %vm123_vm4, %v685_v49  ;;  %v493_v11 = vld [vmem:[%s1575_s1 + $0x80] sm:$0xff] }
 0x3ca   :  { %1304 = vmatprep.subr.bf16.mxu0 %v1303_v48  ;;  %v1294_v12 = vpack.c.bf16 %v493_v11, %v492_v10  ;;  %v588_v10 = vld [vmem:[%s1575_s1 + $0xa8] sm:$0xff]  ;;  %v589_v11 = vld [vmem:[%s1575_s1 + $0xb0] sm:$0xff] }
 0x3cb   :  { %v1311_v14 = vpack.c.bf16 %v589_v11, %v588_v10 }
 0x3cc   :  { %1295 = vmatpush3.bf16.msra.mxu1 %v1294_v12 }
 0x3cd   :  { %1306 = vmatpush3.bf16.msra.mxu0 %v1303_v48  ;;  %1296 = vmatprep.subr.bf16.mxu1 %v1344_v0  ;;  %v830_v0 = vrot.slane %v1403_v32, %v1463_v26 }
 0x3cf   :  { %v838_v21 = vcombine.high %v830_v0, %v830_v0  ;;  %v846_v29 = vrot.slane %v830_v0, %v1463_v26 }
 0x3d0   :  { %1241 = vmatmul.mubr.msk.f32.vlgmr.msra.gmra.mrb[6].mxu0 %vm123_vm4, %v686_v56  ;;  %1298 = vmatpush3.bf16.msra.mxu1 %v1297_v15  ;;  %v1109_v15 = vld [vmem:[%s1575_s1 + $0xe5] ss:$0 sm:$0xff] }
 0x3d1   :  { %1243 = vmatprep.mubr.msk.f32.mxu0 %vm123_vm4, %v687_v59  ;;  %1308 = vmatprep.subr.bf16.mxu1 %v1518_v18  ;;  %v860_v27 = vrot.slane %v838_v21, %v1463_v26  ;;  %v875_v32 = vrot.slane %v846_v29, %v1467_v33  ;;  %v868_v38 = vcombine.high %v846_v29, %v846_v29 }
 0x3d2   :  { %v903_v59 = vrot.slane %v871_v51, %v1467_v33  ;;  %v899_v26 = vrot.slane %v869_v54, %v1467_v33 }
 0x3d3   :  { %v879_v34 = vrot.slane %v860_v27, %v1467_v33  ;;  %v870_v35 = vcombine.high %v860_v27, %v860_v27  ;;  %v883_v45 = vrot.slane %v868_v38, %v1467_v33 }
 0x3d4   :  { %1244 = vmatmul.mubr.msk.f32.gmra.mrb[8].mxu0 %vm123_vm4, %v688_v62 }
 0x3d5   :  { %1246 = vmatprep.mubr.msk.f32.mxu0 %vm123_vm4, %v689_v4  ;;  %v887_v42 = vrot.slane %v870_v35, %v1467_v33 }
 0x3d8   :  { %1247 = vmatmul.mubr.msk.f32.gmra.mrb[10].mxu0 %vm123_vm4, %v690_v7 }
 0x3d9   :  { %1249 = vmatprep.mubr.msk.f32.mxu0 %vm123_vm4, %v691_v8 }
 0x3dc   :  { %1250 = vmatmul.mubr.msk.f32.gmra.mrb[12].mxu0 %vm123_vm4, %v692_v9 }
 0x49b   :  { %v473_v22 = vpop.f32.mrb[4].mxu0 }
 0x49c   :  { %v474_v23 = vadd.f32 %v1107_v19, %v473_v22  ;;  %v1220_v24 = vpop.f32.mrb[5].mxu0 }
 0x49e   :  { %v478_v25 = vand.u32 2147483647, %v474_v23  ;;  %v477_v12 = vmax.f32 %v474_v23, 0.0 }
 0x4a0   :  { %v479_v30 = vsub.f32 0.0, %v478_v25 }
 0x4a2   :  { %v480_v31 = vmul.f32 1.442695, %v479_v30 }
 0x4a3   :  { %v1242_v37 = vpop.f32.mrb[6].mxu0 }
 0x4a4   :  { %1340 = vpow2.f32 %v480_v31  ;;  %v913_v39 = vmul.f32 %v1242_v37, %v879_v34  ;;  %v783_v40 = vpop.f32.mrb[7].mxu0 }
 0x4a5   :  { %v912_v41 = vmul.f32 %v875_v32, %v783_v40 }
 0x4a7   :  { %v1245_v44 = vpop.f32.mrb[8].mxu0 }
 0x4a8   :  { %v915_v47 = vmul.f32 %v1245_v44, %v887_v42  ;;  %v793_v48 = vpop.f32.mrb[9].mxu0 }
 0x4a9   :  { %v914_v49 = vmul.f32 %v883_v45, %v793_v48 }
 0x4ab   :  { %v1248_v52 = vpop.f32.mrb[10].mxu0 }
 0x4ac   :  { %v917_v55 = vmul.f32 %v1248_v52, %v895_v50  ;;  %v803_v56 = vpop.f32.mrb[11].mxu0 }
 0x4ad   :  { %v916_v57 = vmul.f32 %v891_v53, %v803_v56 }
 0x4ae   :  { %v1341_v58 = vpop.eup %1340 }
 0x4af   :  { %v482_v60 = vadd.f32 1.0, %v1341_v58  ;;  %v1251_v61 = vpop.f32.mrb[12].mxu0  ;;  %v485_v4 = vmul.f32 -0.5, %v1341_v58  ;;  %v488_v7 = vand.u32 2147483647, %v1341_v58 }
 0x4b0   :  { %v919_v62 = vmul.f32 %v1251_v61, %v903_v59  ;;  %v813_v1 = vpop.f32.mrb[13].mxu0 }
 0x4b1   :  { %1342 = vlog2.f32 %v482_v60  ;;  %v918_v2 = vmul.f32 %v899_v26, %v813_v1  ;;  %v486_v6 = vadd.f32 1.0, %v485_v4  ;;  %vm489_vm9 = vcmp.lt.f32.partialorder %v488_v7, 0.0004427343 }
 0x4b3   :  { %v487_v9 = vmul.f32 %v1341_v58, %v486_v6 }
 0x4bb   :  { %v1343_v3 = vpop.eup %1342 }
 0x4bc   :  { %v484_v8 = vmul.f32 0.6931472, %v1343_v3 }
 0x4be   :  { %v490_v33 = vsel %vm489_vm9, %v487_v9, %v484_v8 }
 0x4bf   :  { %v491_v13 = vadd.f32 %v490_v33, %v477_v12 }
 0x4c1   :  { %1230 = vmatmul.mubr.msk.f32.vlgmr.msra.gmra.mrb[4].mxu1 %vm123_vm4, %v491_v13 }
 0x4c2   :  { %1310 = vmatpush3.bf16.msra.mxu1 %v1518_v18  ;;  %1260 = vmatprep.mubr.msk.f32.mxu1 %vm123_vm4, %v912_v41 }
 0x4c3   :  { %1312 = vmatprep.subr.bf16.mxu1 %v1311_v14 }
 0x4c6   :  { %1314 = vmatpush3.bf16.msra.mxu1 %v1311_v14 }
 0x4c9   :  { %1261 = vmatmul.mubr.msk.f32.vlgmr.msra.gmra.mrb[6].mxu1 %vm123_vm4, %v913_v39 }
 0x4ca   :  { %1263 = vmatprep.mubr.msk.f32.mxu1 %vm123_vm4, %v914_v49 }
 0x4cd   :  { %1264 = vmatmul.mubr.msk.f32.gmra.mrb[8].mxu1 %vm123_vm4, %v915_v47 }
 0x4ce   :  { %1266 = vmatprep.mubr.msk.f32.mxu1 %vm123_vm4, %v916_v57 }
 0x4d1   :  { %1267 = vmatmul.mubr.msk.f32.gmra.mrb[10].mxu1 %vm123_vm4, %v917_v55 }
 0x4d2   :  { %1269 = vmatprep.mubr.msk.f32.mxu1 %vm123_vm4, %v918_v2 }
 0x4d5   :  { %1270 = vmatmul.mubr.msk.f32.gmra.mrb[12].mxu1 %vm123_vm4, %v919_v62 }
 0x594   :  { %v570_v16 = vpop.f32.mrb[4].mxu1 }
 0x595   :  { %v571_v17 = vadd.f32 %v1109_v15, %v570_v16  ;;  %v1231_v18 = vpop.f32.mrb[5].mxu1 }
 0x597   :  { %1084 = vrot.lane.b32.xlu1 %v571_v17, %s1348_s20  ;;  %v574_v0 = vsub.f32 %v1379_v5, %v571_v17 }
 0x599   :  { %v575_v19 = vmul.f32 %v574_v0, %v574_v0 }
 0x59b   :  { %v576_v20 = vsel %vm19_vm1, %v575_v19, 0.0 }
 0x59c   :  { %v1262_v21 = vpop.f32.mrb[6].mxu1  ;;  %577 = vadd.xlane.f32.xlu0 %v576_v20 }
 0x59d   :  { %v1050_v22 = vmul.f32 %v1262_v21, %v1262_v21  ;;  %v1010_v23 = vpop.f32.mrb[7].mxu1 }
 0x59e   :  { %v1049_v24 = vmul.f32 %v1010_v23, %v1010_v23 }
 0x59f   :  { %v1058_v25 = vsel %vm19_vm1, %v1050_v22, 0.0 }
 0x5a0   :  { %v1057_v27 = vsel %vm19_vm1, %v1049_v24, 0.0  ;;  %v1265_v28 = vpop.f32.mrb[8].mxu1 }
 0x5a1   :  { %v1059_v29 = vadd.f32 %v1058_v25, %v1057_v27  ;;  %v1020_v30 = vpop.f32.mrb[9].mxu1  ;;  %v1052_v31 = vmul.f32 %v1265_v28, %v1265_v28 }
 0x5a2   :  { %v1051_v34 = vmul.f32 %v1020_v30, %v1020_v30 }
 0x5a3   :  { %v1062_v32 = vsel %vm19_vm1, %v1052_v31, 0.0 }
 0x5a4   :  { %v1060_v35 = vsel %vm19_vm1, %v1051_v34, 0.0  ;;  %v1268_v5 = vpop.f32.mrb[10].mxu1 }
 0x5a5   :  { %v1061_v36 = vadd.f32 %v1060_v35, %v1059_v29  ;;  %v1030_v37 = vpop.f32.mrb[11].mxu1  ;;  %v1054_v38 = vmul.f32 %v1268_v5, %v1268_v5 }
 0x5a6   :  { %v1053_v39 = vmul.f32 %v1030_v37, %v1030_v37 }
 0x5a7   :  { %v1063_v40 = vadd.f32 %v1062_v32, %v1061_v36  ;;  %v1066_v45 = vsel %vm19_vm1, %v1054_v38, 0.0 }
 0x5a8   :  { %v1064_v41 = vsel %vm19_vm1, %v1053_v39, 0.0  ;;  %v1271_v42 = vpop.f32.mrb[12].mxu1 }
 0x5a9   :  { %v1065_v43 = vadd.f32 %v1064_v41, %v1063_v40  ;;  %v1040_v44 = vpop.f32.mrb[13].mxu1  ;;  %v1056_v46 = vmul.f32 %v1271_v42, %v1271_v42 }
 0x5aa   :  { %v1055_v47 = vmul.f32 %v1040_v44, %v1040_v44 }
 0x5ab   :  { %v1067_v48 = vadd.f32 %v1066_v45, %v1065_v43  ;;  %v1070_v51 = vsel %vm19_vm1, %v1056_v46, 0.0 }
 0x5ac   :  { %v1068_v49 = vsel %vm19_vm1, %v1055_v47, 0.0 }
 0x5ad   :  { %v1069_v50 = vadd.f32 %v1068_v49, %v1067_v48 }
 0x5af   :  { %v1071_v52 = vadd.f32 %v1070_v51, %v1069_v50 }
 0x5b1   :  { %1072 = vadd.xlane.f32.xlu0 %v1071_v52 }
 0x609   :  { %v1085_v6 = vpop.permute.xlu1 %1084 }
 0x60a   :  { %v1087_v3 = vsel %vm306_vm7, %v1435_v63, %v1085_v6 }
 0x629   :  { %v578_v53 = vpop.xlane.xlu0 %577 }
 0x62a   :  { %v579_v54 = vrot.slane %v578_v53, 4 }
 0x62c   :  { %v580_v55 = vadd.f32 %v579_v54, %v578_v53 }
 0x62e   :  { %v581_v56 = vrot.slane %v580_v55, 2 }
 0x630   :  { %v582_v57 = vadd.f32 %v581_v56, %v580_v55 }
 0x632   :  { %v583_v58 = vrot.slane %v582_v57, 1 }
 0x634   :  { %v584_v59 = vadd.f32 %v583_v58, %v582_v57 }
 0x636   :  { %1315 = vpush %v584_v59 }
 0x63e   :  { %v1073_v60 = vpop.xlane.xlu0 %1072 }
 0x63f   :  { %v1074_v61 = vrot.slane %v1073_v60, 4 }
 0x641   :  { %v1075_v26 = vadd.f32 %v1074_v61, %v1073_v60 }
 0x643   :  { %v1076_v62 = vrot.slane %v1075_v26, 2 }
 0x645   :  { %v1077_v1 = vadd.f32 %v1076_v62, %v1075_v26 }
 0x647   :  { %v1078_v2 = vrot.slane %v1077_v1, 1 }
 0x649   :  { %v1079_v4 = vadd.f32 %v1078_v2, %v1077_v1 }
 0x64b   :  { %1317 = vpush %v1079_v4 }
 0x667   :  { %s1316_s1 = spop %1315 }
 0x668   :  { %v1081_v7 = vstv %s1316_s1 }
 0x669   :  { %v1089_v8 = vsel %vm1088_vm10, %v1087_v3, %v1081_v7 }
 0x67c   :  { %s1318_s21 = spop %1317 }
 0x67d   :  { %v1082_v9 = vstv %s1318_s21 }
 0x67e   :  { %v1091_v10 = vsel %vm1090_vm11, %v1089_v8, %v1082_v9 }
 0x67f   :  { %v1093_v11 = vsel %vm1092_vm12, %v1091_v10, 0.0 }
 0x680   :  { %1094 = vst [vmem:[%s1577_s2] sm:$0xff] %v1093_v11 }

</bundles_post_ra>
